<compile_context>
chip_gen: v5e
topology: v5e:2x2
jax: 0.10.0
libtpu: 0.0.40
codegen_flags: <defaults>
</compile_context>

<pallas_src>
import jax
import jax.numpy as jnp
from jax.experimental import pallas as pl
from jax.experimental.pallas import tpu as pltpu

HID = 128  # lane-padded hidden width (true hidden sizes are 80 / 50 / 20)


def mlp_kernel(x_ref,
               w1_ref, b1_ref,
               w2_ref, b2_ref,
               w3_ref, b3_ref,
               w4_ref, b4_ref,
               o_ref):
    # In-kernel bf16 cast of the input block (free VPU pack; x stays f32 in HBM).
    x = x_ref[...].astype(jnp.bfloat16)
    # fc1 + relu1  (bf16 matmul operands, f32 accumulate / bias / ReLU)
    h = jnp.dot(x, w1_ref[...], preferred_element_type=jnp.float32)
    h = jnp.maximum(h + b1_ref[...], 0.0)
    # fc2 + relu2
    h = jnp.dot(h.astype(jnp.bfloat16), w2_ref[...],
                preferred_element_type=jnp.float32)
    h = jnp.maximum(h + b2_ref[...], 0.0)
    # fc3 + relu3
    h = jnp.dot(h.astype(jnp.bfloat16), w3_ref[...],
                preferred_element_type=jnp.float32)
    h = jnp.maximum(h + b3_ref[...], 0.0)
    # fc4 (no activation) — narrow (TB, n_out) store, lane-padding dropped.
    h = jnp.dot(h.astype(jnp.bfloat16), w4_ref[...],
                preferred_element_type=jnp.float32)
    o_ref[...] = (h + b4_ref[...]).astype(o_ref.dtype)


def _round_up(n, m):
    return ((n + m - 1) // m) * m


def _pad_to(a, shape):
    return jnp.pad(a, [(0, s - d) for d, s in zip(a.shape, shape)])


def _choose_tile(B, block_b):
    """Batch tile: multiple of 128, <= padded batch, >= 2 blocks when possible."""
    b128 = _round_up(max(B, 1), 128)
    TB = min(_round_up(max(block_b, 1), 128), b128)
    # If the whole (padded) batch spans >= 2 tiles of 128 but would fit in a
    # single block, split it in two so the "parallel" axis can feed both
    # TensorCores on v7x (no-op on v5e/v6e).
    if b128 >= 2 * 128 and TB >= b128:
        TB = _round_up((b128 + 1) // 2, 128)
    return TB


def agnostic_pan_forward(x, params, *, block_b=2048):
    """x: (B, input_size) float32. params: dict of (in,out) weights + (1,out) biases."""
    B, d_in = x.shape
    n_out = params["w4"].shape[1]  # 2

    TB = _choose_tile(B, block_b)
    B_pad = _round_up(B, TB)

    # Batch padding only (x stays f32; bf16 cast happens inside the kernel).
    x_p = x if B_pad == B else jnp.pad(x, ((0, B_pad - B), (0, 0)))

    # Zero-pad hidden dims to 128 lanes (exactly preserved by zero bias + ReLU);
    # matmul operands in bf16, biases in f32.
    w1 = _pad_to(params["w1"], (d_in, HID)).astype(jnp.bfloat16)
    b1 = _pad_to(params["b1"], (1, HID))
    w2 = _pad_to(params["w2"], (HID, HID)).astype(jnp.bfloat16)
    b2 = _pad_to(params["b2"], (1, HID))
    w3 = _pad_to(params["w3"], (HID, HID)).astype(jnp.bfloat16)
    b3 = _pad_to(params["b3"], (1, HID))
    w4 = _pad_to(params["w4"], (HID, n_out)).astype(jnp.bfloat16)
    b4 = params["b4"]

    args = (x_p, w1, b1, w2, b2, w3, b3, w4, b4)
    num_blocks = B_pad // TB

    def resident_spec(a):
        # Full-array block, same block index every grid step -> stays in VMEM.
        return pl.BlockSpec(a.shape, lambda i: (0,) * a.ndim)

    in_specs = [pl.BlockSpec((TB, d_in), lambda i: (i, 0))]
    in_specs += [resident_spec(a) for a in args[1:]]

    out = pl.pallas_call(
        mlp_kernel,
        out_shape=jax.ShapeDtypeStruct((B_pad, n_out), jnp.float32),
        grid_spec=pl.GridSpec(
            grid=(num_blocks,),
            in_specs=in_specs,
            out_specs=pl.BlockSpec((TB, n_out), lambda i: (i, 0)),
        ),
        compiler_params=pltpu.CompilerParams(
            dimension_semantics=("parallel",)),
    )(*args)

    return out[:B, :]


def init_params(key, input_size):
    """Deterministic init mimicking nn.Linear default: U(-1/sqrt(fan_in), 1/sqrt(fan_in))."""
    dims = [(input_size, 80), (80, 50), (50, 20), (20, 2)]
    params = {}
    for idx, (fan_in, fan_out) in enumerate(dims, start=1):
        key, kw, kb = jax.random.split(key, 3)
        bound = 1.0 / jnp.sqrt(jnp.float32(fan_in))
        params[f"w{idx}"] = jax.random.uniform(
            kw, (fan_in, fan_out), jnp.float32, -bound, bound)
        params[f"b{idx}"] = jax.random.uniform(
            kb, (1, fan_out), jnp.float32, -bound, bound)
    return params


def reference_forward(x, params):
    """Pure-JAX reference with the same bf16 matmul operands / f32 accumulation."""
    bf = jnp.bfloat16

    def lin(h, w, b):
        return jnp.dot(h.astype(bf), w.astype(bf),
                       preferred_element_type=jnp.float32) + b

    h = jnp.maximum(lin(x, params["w1"], params["b1"]), 0.0)
    h = jnp.maximum(lin(h, params["w2"], params["b2"]), 0.0)
    h = jnp.maximum(lin(h, params["w3"], params["b3"]), 0.0)
    return lin(h, params["w4"], params["b4"])


if __name__ == "__main__":
    input_size = 32
    batch = 8

    key = jax.random.PRNGKey(0)
    key, kx = jax.random.split(key)
    x = jax.random.normal(kx, (batch, input_size), jnp.float32)
    params = init_params(key, input_size)

    out = agnostic_pan_forward(x, params)
    out = jax.block_until_ready(out)

    ref = reference_forward(x, params)
    assert out.shape == (batch, 2)
    assert jnp.allclose(out, ref, atol=2e-2, rtol=2e-2), "mismatch vs reference"

    print("KERNEL_OK")
</pallas_src>

<mosaic_0001>
module attributes {stable_mosaic.version = 11 : i64} {
  func.func @mlp_kernel(%arg0: i32, %arg1: memref<128x32xf32, #tpu.memory_space<vmem>>, %arg2: memref<32x128xbf16, #tpu.memory_space<vmem>>, %arg3: memref<1x128xf32, #tpu.memory_space<vmem>>, %arg4: memref<128x128xbf16, #tpu.memory_space<vmem>>, %arg5: memref<1x128xf32, #tpu.memory_space<vmem>>, %arg6: memref<128x128xbf16, #tpu.memory_space<vmem>>, %arg7: memref<1x128xf32, #tpu.memory_space<vmem>>, %arg8: memref<128x2xbf16, #tpu.memory_space<vmem>>, %arg9: memref<1x2xf32, #tpu.memory_space<vmem>>, %arg10: memref<128x2xf32, #tpu.memory_space<vmem>>) attributes {dimension_semantics = [#tpu.dimension_semantics<parallel>], iteration_bounds = array<i64: 1>, scalar_prefetch = 0 : i64, scratch_operands = 0 : i64, tpu.core_type = #tpu.core_type<tc>, window_params = [{transform_indices = @transform_0, window_bounds = array<i64: 128, 32>}, {pipeline_mode = #tpu.pipeline_mode<synchronous>, transform_indices = @transform_1, window_bounds = array<i64: 32, 128>}, {pipeline_mode = #tpu.pipeline_mode<synchronous>, transform_indices = @transform_2, window_bounds = array<i64: 1, 128>}, {pipeline_mode = #tpu.pipeline_mode<synchronous>, transform_indices = @transform_3, window_bounds = array<i64: 128, 128>}, {pipeline_mode = #tpu.pipeline_mode<synchronous>, transform_indices = @transform_4, window_bounds = array<i64: 1, 128>}, {pipeline_mode = #tpu.pipeline_mode<synchronous>, transform_indices = @transform_5, window_bounds = array<i64: 128, 128>}, {pipeline_mode = #tpu.pipeline_mode<synchronous>, transform_indices = @transform_6, window_bounds = array<i64: 1, 128>}, {pipeline_mode = #tpu.pipeline_mode<synchronous>, transform_indices = @transform_7, window_bounds = array<i64: 128, 2>}, {pipeline_mode = #tpu.pipeline_mode<synchronous>, transform_indices = @transform_8, window_bounds = array<i64: 1, 2>}, {transform_indices = @transform_9, window_bounds = array<i64: 128, 2>}]} {
    %c0 = arith.constant 0 : index
    %c0_0 = arith.constant 0 : index
    %0 = vector.load %arg1[%c0, %c0_0] : memref<128x32xf32, #tpu.memory_space<vmem>>, vector<128x32xf32>
    %1 = arith.truncf %0 : vector<128x32xf32> to vector<128x32xbf16>
    %c0_1 = arith.constant 0 : index
    %c0_2 = arith.constant 0 : index
    %2 = vector.load %arg2[%c0_1, %c0_2] : memref<32x128xbf16, #tpu.memory_space<vmem>>, vector<32x128xbf16>
    %cst = arith.constant dense<0.000000e+00> : vector<128x128xf32>
    %3 = tpu.matmul %1, %2, %cst {dimension_numbers = #tpu.dot_dimension_numbers<[1], [0], [0], [1], [0, 0, 1, 1], [], []>} : vector<128x32xbf16>, vector<32x128xbf16>, vector<128x128xf32> -> vector<128x128xf32>
    %c0_3 = arith.constant 0 : index
    %c0_4 = arith.constant 0 : index
    %4 = vector.load %arg3[%c0_3, %c0_4] : memref<1x128xf32, #tpu.memory_space<vmem>>, vector<1x128xf32>
    %5 = vector.broadcast %4 : vector<1x128xf32> to vector<128x128xf32>
    %6 = arith.addf %3, %5 : vector<128x128xf32>
    %cst_5 = arith.constant 0.000000e+00 : f32
    %7 = vector.broadcast %cst_5 : f32 to vector<128x128xf32>
    %8 = arith.maximumf %6, %7 : vector<128x128xf32>
    %9 = arith.truncf %8 : vector<128x128xf32> to vector<128x128xbf16>
    %c0_6 = arith.constant 0 : index
    %c0_7 = arith.constant 0 : index
    %10 = vector.load %arg4[%c0_6, %c0_7] : memref<128x128xbf16, #tpu.memory_space<vmem>>, vector<128x128xbf16>
    %cst_8 = arith.constant dense<0.000000e+00> : vector<128x128xf32>
    %11 = tpu.matmul %9, %10, %cst_8 {dimension_numbers = #tpu.dot_dimension_numbers<[1], [0], [0], [1], [0, 0, 1, 1], [], []>} : vector<128x128xbf16>, vector<128x128xbf16>, vector<128x128xf32> -> vector<128x128xf32>
    %c0_9 = arith.constant 0 : index
    %c0_10 = arith.constant 0 : index
    %12 = vector.load %arg5[%c0_9, %c0_10] : memref<1x128xf32, #tpu.memory_space<vmem>>, vector<1x128xf32>
    %13 = vector.broadcast %12 : vector<1x128xf32> to vector<128x128xf32>
    %14 = arith.addf %11, %13 : vector<128x128xf32>
    %cst_11 = arith.constant 0.000000e+00 : f32
    %15 = vector.broadcast %cst_11 : f32 to vector<128x128xf32>
    %16 = arith.maximumf %14, %15 : vector<128x128xf32>
    %17 = arith.truncf %16 : vector<128x128xf32> to vector<128x128xbf16>
    %c0_12 = arith.constant 0 : index
    %c0_13 = arith.constant 0 : index
    %18 = vector.load %arg6[%c0_12, %c0_13] : memref<128x128xbf16, #tpu.memory_space<vmem>>, vector<128x128xbf16>
    %cst_14 = arith.constant dense<0.000000e+00> : vector<128x128xf32>
    %19 = tpu.matmul %17, %18, %cst_14 {dimension_numbers = #tpu.dot_dimension_numbers<[1], [0], [0], [1], [0, 0, 1, 1], [], []>} : vector<128x128xbf16>, vector<128x128xbf16>, vector<128x128xf32> -> vector<128x128xf32>
    %c0_15 = arith.constant 0 : index
    %c0_16 = arith.constant 0 : index
    %20 = vector.load %arg7[%c0_15, %c0_16] : memref<1x128xf32, #tpu.memory_space<vmem>>, vector<1x128xf32>
    %21 = vector.broadcast %20 : vector<1x128xf32> to vector<128x128xf32>
    %22 = arith.addf %19, %21 : vector<128x128xf32>
    %cst_17 = arith.constant 0.000000e+00 : f32
    %23 = vector.broadcast %cst_17 : f32 to vector<128x128xf32>
    %24 = arith.maximumf %22, %23 : vector<128x128xf32>
    %25 = arith.truncf %24 : vector<128x128xf32> to vector<128x128xbf16>
    %c0_18 = arith.constant 0 : index
    %c0_19 = arith.constant 0 : index
    %26 = vector.load %arg8[%c0_18, %c0_19] : memref<128x2xbf16, #tpu.memory_space<vmem>>, vector<128x2xbf16>
    %cst_20 = arith.constant dense<0.000000e+00> : vector<128x2xf32>
    %27 = tpu.matmul %25, %26, %cst_20 {dimension_numbers = #tpu.dot_dimension_numbers<[1], [0], [0], [1], [0, 0, 1, 1], [], []>} : vector<128x128xbf16>, vector<128x2xbf16>, vector<128x2xf32> -> vector<128x2xf32>
    %c0_21 = arith.constant 0 : index
    %c0_22 = arith.constant 0 : index
    %28 = vector.load %arg9[%c0_21, %c0_22] : memref<1x2xf32, #tpu.memory_space<vmem>>, vector<1x2xf32>
    %29 = vector.broadcast %28 : vector<1x2xf32> to vector<128x2xf32>
    %30 = arith.addf %27, %29 : vector<128x2xf32>
    %c0_23 = arith.constant 0 : index
    %c0_24 = arith.constant 0 : index
    %31 = vector.load %arg10[%c0_23, %c0_24] : memref<128x2xf32, #tpu.memory_space<vmem>>, vector<128x2xf32>
    tpu.vector_store %arg10[%c0_23, %c0_24], %30 {strides = array<i32>} : memref<128x2xf32, #tpu.memory_space<vmem>>, vector<128x2xf32>,
    return
  }
  func.func @transform_0(%arg0: i32) -> (i32, i32) {
    %c0_i32 = arith.constant 0 : i32
    %c0_i32_0 = arith.constant 0 : i32
    return %arg0, %c0_i32 : i32, i32
  }
  func.func @transform_1(%arg0: i32) -> (i32, i32) {
    %c0_i32 = arith.constant 0 : i32
    %c0_i32_0 = arith.constant 0 : i32
    %c0_i32_1 = arith.constant 0 : i32
    return %c0_i32, %c0_i32_0 : i32, i32
  }
  func.func @transform_2(%arg0: i32) -> (i32, i32) {
    %c0_i32 = arith.constant 0 : i32
    %c0_i32_0 = arith.constant 0 : i32
    %c0_i32_1 = arith.constant 0 : i32
    return %c0_i32, %c0_i32_0 : i32, i32
  }
  func.func @transform_3(%arg0: i32) -> (i32, i32) {
    %c0_i32 = arith.constant 0 : i32
    %c0_i32_0 = arith.constant 0 : i32
    %c0_i32_1 = arith.constant 0 : i32
    return %c0_i32, %c0_i32_0 : i32, i32
  }
  func.func @transform_4(%arg0: i32) -> (i32, i32) {
    %c0_i32 = arith.constant 0 : i32
    %c0_i32_0 = arith.constant 0 : i32
    %c0_i32_1 = arith.constant 0 : i32
    return %c0_i32, %c0_i32_0 : i32, i32
  }
  func.func @transform_5(%arg0: i32) -> (i32, i32) {
    %c0_i32 = arith.constant 0 : i32
    %c0_i32_0 = arith.constant 0 : i32
    %c0_i32_1 = arith.constant 0 : i32
    return %c0_i32, %c0_i32_0 : i32, i32
  }
  func.func @transform_6(%arg0: i32) -> (i32, i32) {
    %c0_i32 = arith.constant 0 : i32
    %c0_i32_0 = arith.constant 0 : i32
    %c0_i32_1 = arith.constant 0 : i32
    return %c0_i32, %c0_i32_0 : i32, i32
  }
  func.func @transform_7(%arg0: i32) -> (i32, i32) {
    %c0_i32 = arith.constant 0 : i32
    %c0_i32_0 = arith.constant 0 : i32
    %c0_i32_1 = arith.constant 0 : i32
    return %c0_i32, %c0_i32_0 : i32, i32
  }
  func.func @transform_8(%arg0: i32) -> (i32, i32) {
    %c0_i32 = arith.constant 0 : i32
    %c0_i32_0 = arith.constant 0 : i32
    %c0_i32_1 = arith.constant 0 : i32
    return %c0_i32, %c0_i32_0 : i32, i32
  }
  func.func @transform_9(%arg0: i32) -> (i32, i32) {
    %c0_i32 = arith.constant 0 : i32
    %c0_i32_0 = arith.constant 0 : i32
    return %arg0, %c0_i32 : i32, i32
  }
}

</mosaic_0001>

<bundles_post_ra>
// kernel: tpu_custom_call.1
= control target key start
LH: loop header
LB: loop body
LE: loop exit
PB: predicated region body
PF: predicated region fallthrough
CT: control target
= control target key end

     0   :  { %vm77_vm0 = vcmask 261120   ;;  %vm574_vm1 = vcmask 15360   ;;  %s1033_s1 = inlined_call_operand.vmem [shape: bf16[32,128], index: 1, kind: input, shape index: {}]   ;;  %s1034_s0 = inlined_call_operand.vmem [shape: f32[128,32], index: 0, kind: input, shape index: {}]   ;;  %s1035_s2 = inlined_call_operand.vmem [shape: f32[1,128], index: 2, kind: input, shape index: {}]   ;;  %s1036_s3 = inlined_call_operand.vmem [shape: bf16[128,128], index: 3, kind: input, shape index: {}]   ;;  %s1037_s4 = inlined_call_operand.vmem [shape: f32[1,128], index: 4, kind: input, shape index: {}]   ;;  %s1038_s5 = inlined_call_operand.vmem [shape: bf16[128,128], index: 5, kind: input, shape index: {}]   ;;  %s1039_s6 = inlined_call_operand.vmem [shape: f32[1,128], index: 6, kind: input, shape index: {}]   ;;  %s1040_s7 = inlined_call_operand.vmem [shape: bf16[128,2], index: 7, kind: input, shape index: {}]   ;;  %s1041_s8 = inlined_call_operand.vmem [shape: f32[1,2], index: 8, kind: input, shape index: {}]   ;;  %s1042_s9 = inlined_call_operand.vmem [shape: f32[128,2], index: 9, kind: output, shape index: {}]  }
   0x1   :  { %v708_v0 = vld [vmem:[%s1033_s1 + $0x8] sm:$0xff]  ;;  %v707_v1 = vld [vmem:[%s1033_s1] sm:$0xff]  ;;  %v35_v5 = vld [vmem:[%s1034_s0 + $0x10] sm:$0xff] }
   0x2   :  { %108 = vmatpush.bf16.msra.mxu0 %v708_v0  ;;  %v33_v2 = vld [vmem:[%s1034_s0] sm:$0xff]  ;;  %v34_v3 = vld [vmem:[%s1034_s0 + $0x8] sm:$0xff]  ;;  %v36_v6 = vld [vmem:[%s1034_s0 + $0x18] sm:$0xff] }
   0x3   :  { %v49_v4 = vpack.c.bf16 %v34_v3, %v33_v2  ;;  %v50_v7 = vpack.c.bf16 %v36_v6, %v35_v5  ;;  %v37_v8 = vld [vmem:[%s1034_s0 + $0x20] sm:$0xff]  ;;  %v38_v9 = vld [vmem:[%s1034_s0 + $0x28] sm:$0xff]  ;;  %v39_v11 = vld [vmem:[%s1034_s0 + $0x30] sm:$0xff] }
   0x4   :  { %v51_v10 = vpack.c.bf16 %v38_v9, %v37_v8  ;;  %v40_v12 = vld [vmem:[%s1034_s0 + $0x38] sm:$0xff]  ;;  %v41_v14 = vld [vmem:[%s1034_s0 + $0x40] sm:$0xff]  ;;  %v42_v15 = vld [vmem:[%s1034_s0 + $0x48] sm:$0xff] }
   0x5   :  { %v52_v13 = vpack.c.bf16 %v40_v12, %v39_v11  ;;  %v53_v16 = vpack.c.bf16 %v42_v15, %v41_v14  ;;  %v716_v17 = vld [vmem:[%s1036_s3 + $0x38] sm:$0xff]  ;;  %v43_v18 = vld [vmem:[%s1034_s0 + $0x50] sm:$0xff]  ;;  %v714_v22 = vld [vmem:[%s1036_s3 + $0x28] sm:$0xff] }
   0x6   :  { %109 = vmatpush.bf16.msra.mxu0 %v707_v1  ;;  %243 = vmatpush.bf16.msra.mxu1 %v716_v17  ;;  %v44_v19 = vld [vmem:[%s1034_s0 + $0x58] sm:$0xff]  ;;  %v715_v21 = vld [vmem:[%s1036_s3 + $0x30] sm:$0xff]  ;;  %v713_v23 = vld [vmem:[%s1036_s3 + $0x20] sm:$0xff] }
   0x7   :  { %v54_v20 = vpack.c.bf16 %v44_v19, %v43_v18  ;;  %v45_v24 = vld [vmem:[%s1034_s0 + $0x60] sm:$0xff]  ;;  %v46_v25 = vld [vmem:[%s1034_s0 + $0x68] sm:$0xff]  ;;  %v712_v26 = vld [vmem:[%s1036_s3 + $0x18] sm:$0xff] }
   0x8   :  { %v55_v27 = vpack.c.bf16 %v46_v25, %v45_v24  ;;  %v711_v28 = vld [vmem:[%s1036_s3 + $0x10] sm:$0xff]  ;;  %v710_v29 = vld [vmem:[%s1036_s3 + $0x8] sm:$0xff]  ;;  %v709_v30 = vld [vmem:[%s1036_s3] sm:$0xff] }
   0x9   :  { %603 = vmatmul.msk.bf16.vlgmr.msra.gmra.mxu0 %vm77_vm0, %v49_v4  ;;  %v47_v31 = vld [vmem:[%s1034_s0 + $0x70] sm:$0xff]  ;;  %v48_v32 = vld [vmem:[%s1034_s0 + $0x78] sm:$0xff]  ;;  %v876_v35 = vld [vmem:[%s1035_s2] ss:$0 sm:$0xff] }
   0xa   :  { %244 = vmatpush.bf16.msra.mxu1 %v715_v21  ;;  %v56_v33 = vpack.c.bf16 %v48_v32, %v47_v31  ;;  %v723_v14 = vld [vmem:[%s1038_s5 + $0x30] sm:$0xff]  ;;  %v721_v17 = vld [vmem:[%s1038_s5 + $0x20] sm:$0xff]  ;;  %v720_v21 = vld [vmem:[%s1038_s5 + $0x18] sm:$0xff] }
   0xb   :  { %v719_v25 = vld [vmem:[%s1038_s5 + $0x10] sm:$0xff] }
   0xe   :  { %245 = vmatpush.bf16.msra.mxu1 %v714_v22 }
  0x12   :  { %246 = vmatpush.bf16.msra.mxu1 %v713_v23 }
  0x16   :  { %247 = vmatpush.bf16.msra.mxu1 %v712_v26 }
  0x19   :  { %604 = vmatmul.msk.bf16.gmra.mxu0 %vm77_vm0, %v50_v7 }
  0x1a   :  { %248 = vmatpush.bf16.msra.mxu1 %v711_v28  ;;  %v717_v28 = vld [vmem:[%s1038_s5] sm:$0xff] }
  0x1e   :  { %249 = vmatpush.bf16.msra.mxu1 %v710_v29 }
  0x22   :  { %250 = vmatpush.bf16.msra.mxu1 %v709_v30 }
  0x29   :  { %605 = vmatmul.msk.bf16.gmra.mxu0 %vm77_vm0, %v51_v10  ;;  %v724_v10 = vld [vmem:[%s1038_s5 + $0x38] sm:$0xff] }
  0x2a   :  { %384 = vmatpush.bf16.msra.mxu2 %v724_v10 }
  0x2e   :  { %385 = vmatpush.bf16.msra.mxu2 %v723_v14  ;;  %v732_v14 = vld [vmem:[%s1040_s7 + $0x38] sm:$0xff] }
  0x2f   :  { %525 = vmatpush.bf16.msra.mxu3 %v732_v14 }
  0x39   :  { %606 = vmatmul.msk.bf16.gmra.mxu0 %vm77_vm0, %v52_v13 }
  0x49   :  { %607 = vmatmul.msk.bf16.gmra.mxu0 %vm77_vm0, %v53_v16  ;;  %v722_v16 = vld [vmem:[%s1038_s5 + $0x28] sm:$0xff] }
  0x4a   :  { %386 = vmatpush.bf16.msra.mxu2 %v722_v16  ;;  %v731_v16 = vld [vmem:[%s1040_s7 + $0x30] sm:$0xff] }
  0x4b   :  { %526 = vmatpush.bf16.msra.mxu3 %v731_v16 }
  0x4e   :  { %387 = vmatpush.bf16.msra.mxu2 %v721_v17  ;;  %v730_v17 = vld [vmem:[%s1040_s7 + $0x28] sm:$0xff] }
  0x4f   :  { %527 = vmatpush.bf16.msra.mxu3 %v730_v17 }
  0x52   :  { %388 = vmatpush.bf16.msra.mxu2 %v720_v21  ;;  %v729_v21 = vld [vmem:[%s1040_s7 + $0x20] sm:$0xff] }
  0x53   :  { %528 = vmatpush.bf16.msra.mxu3 %v729_v21 }
  0x56   :  { %389 = vmatpush.bf16.msra.mxu2 %v719_v25 }
  0x59   :  { %608 = vmatmul.msk.bf16.gmra.mxu0 %vm77_vm0, %v54_v20 }
  0x69   :  { %609 = vmatmul.msk.bf16.gmra.mxu0 %vm77_vm0, %v55_v27  ;;  %v718_v27 = vld [vmem:[%s1038_s5 + $0x8] sm:$0xff] }
  0x6a   :  { %390 = vmatpush.bf16.msra.mxu2 %v718_v27  ;;  %v727_v27 = vld [vmem:[%s1040_s7 + $0x10] sm:$0xff] }
  0x6e   :  { %391 = vmatpush.bf16.msra.mxu2 %v717_v28 }
  0x79   :  { %610 = vmatmul.msk.bf16.gmra.mxu0 %vm77_vm0, %v56_v33 }
  0x86   :  { %v111_v34 = vpop.f32.mrf.mxu0 }
  0x87   :  { %v112_v36 = vadd.f32 %v876_v35, %v111_v34 }
  0x89   :  { %v151_v39 = vmax.f32 %v112_v36, 0.0 }
  0x8e   :  { %v113_v37 = vpop.f32.mrf.mxu0 }
  0x8f   :  { %v114_v38 = vadd.f32 %v876_v35, %v113_v37  ;;  %v921_v37 = vld [vmem:[%s1037_s4] ss:$0 sm:$0xff] }
  0x91   :  { %v152_v40 = vmax.f32 %v114_v38, 0.0 }
  0x93   :  { %v167_v41 = vpack.c.bf16 %v152_v40, %v151_v39 }
  0x95   :  { %251 = vmatmul.bf16.vlgmr.msra.gmra.mxu1 %v167_v41 }
  0x96   :  { %v116_v42 = vpop.f32.mrf.mxu0 }
  0x97   :  { %v117_v43 = vadd.f32 %v876_v35, %v116_v42 }
  0x99   :  { %v153_v46 = vmax.f32 %v117_v43, 0.0 }
  0x9e   :  { %v118_v44 = vpop.f32.mrf.mxu0 }
  0x9f   :  { %v119_v45 = vadd.f32 %v876_v35, %v118_v44 }
  0xa1   :  { %v154_v47 = vmax.f32 %v119_v45, 0.0 }
  0xa3   :  { %v168_v48 = vpack.c.bf16 %v154_v47, %v153_v46 }
  0xa5   :  { %256 = vmatmul.bf16.gmra.mxu1 %v168_v48 }
  0xa6   :  { %v121_v49 = vpop.f32.mrf.mxu0 }
  0xa7   :  { %v122_v50 = vadd.f32 %v876_v35, %v121_v49 }
  0xa9   :  { %v155_v53 = vmax.f32 %v122_v50, 0.0 }
  0xae   :  { %v123_v51 = vpop.f32.mrf.mxu0 }
  0xaf   :  { %v124_v52 = vadd.f32 %v876_v35, %v123_v51 }
  0xb1   :  { %v156_v54 = vmax.f32 %v124_v52, 0.0 }
  0xb3   :  { %v169_v55 = vpack.c.bf16 %v156_v54, %v155_v53 }
  0xb5   :  { %261 = vmatmul.bf16.gmra.mxu1 %v169_v55 }
  0xb6   :  { %v126_v56 = vpop.f32.mrf.mxu0 }
  0xb7   :  { %v127_v57 = vadd.f32 %v876_v35, %v126_v56 }
  0xb9   :  { %v157_v60 = vmax.f32 %v127_v57, 0.0 }
  0xbe   :  { %v128_v58 = vpop.f32.mrf.mxu0 }
  0xbf   :  { %v129_v59 = vadd.f32 %v876_v35, %v128_v58 }
  0xc1   :  { %v158_v61 = vmax.f32 %v129_v59, 0.0 }
  0xc3   :  { %v170_v62 = vpack.c.bf16 %v158_v61, %v157_v60 }
  0xc5   :  { %266 = vmatmul.bf16.gmra.mxu1 %v170_v62 }
  0xc6   :  { %v131_v63 = vpop.f32.mrf.mxu0 }
  0xc7   :  { %v132_v0 = vadd.f32 %v876_v35, %v131_v63 }
  0xc9   :  { %v159_v3 = vmax.f32 %v132_v0, 0.0 }
  0xce   :  { %v133_v1 = vpop.f32.mrf.mxu0 }
  0xcf   :  { %v134_v2 = vadd.f32 %v876_v35, %v133_v1 }
  0xd1   :  { %v160_v4 = vmax.f32 %v134_v2, 0.0 }
  0xd3   :  { %v171_v5 = vpack.c.bf16 %v160_v4, %v159_v3 }
  0xd5   :  { %271 = vmatmul.bf16.gmra.mxu1 %v171_v5 }
  0xd6   :  { %v136_v6 = vpop.f32.mrf.mxu0 }
  0xd7   :  { %v137_v7 = vadd.f32 %v876_v35, %v136_v6 }
  0xd9   :  { %v161_v11 = vmax.f32 %v137_v7, 0.0 }
  0xde   :  { %v138_v8 = vpop.f32.mrf.mxu0 }
  0xdf   :  { %v139_v9 = vadd.f32 %v876_v35, %v138_v8 }
  0xe1   :  { %v162_v12 = vmax.f32 %v139_v9, 0.0 }
  0xe3   :  { %v172_v13 = vpack.c.bf16 %v162_v12, %v161_v11 }
  0xe5   :  { %276 = vmatmul.bf16.gmra.mxu1 %v172_v13 }
  0xe6   :  { %v141_v15 = vpop.f32.mrf.mxu0 }
  0xe7   :  { %v142_v18 = vadd.f32 %v876_v35, %v141_v15 }
  0xe9   :  { %v163_v22 = vmax.f32 %v142_v18, 0.0 }
  0xee   :  { %v143_v19 = vpop.f32.mrf.mxu0 }
  0xef   :  { %v144_v20 = vadd.f32 %v876_v35, %v143_v19 }
  0xf1   :  { %v164_v23 = vmax.f32 %v144_v20, 0.0 }
  0xf3   :  { %v173_v24 = vpack.c.bf16 %v164_v23, %v163_v22 }
  0xf5   :  { %281 = vmatmul.bf16.gmra.mxu1 %v173_v24 }
  0xf6   :  { %v146_v26 = vpop.f32.mrf.mxu0 }
  0xf7   :  { %v147_v29 = vadd.f32 %v876_v35, %v146_v26  ;;  %v728_v26 = vld [vmem:[%s1040_s7 + $0x18] sm:$0xff] }
  0xf8   :  { %529 = vmatpush.bf16.msra.mxu3 %v728_v26 }
  0xf9   :  { %v165_v32 = vmax.f32 %v147_v29, 0.0 }
  0xfc   :  { %530 = vmatpush.bf16.msra.mxu3 %v727_v27 }
  0xfe   :  { %v148_v30 = vpop.f32.mrf.mxu0 }
  0xff   :  { %v149_v31 = vadd.f32 %v876_v35, %v148_v30  ;;  %v726_v30 = vld [vmem:[%s1040_s7 + $0x8] sm:$0xff] }
 0x100   :  { %531 = vmatpush.bf16.msra.mxu3 %v726_v30 }
 0x101   :  { %v166_v33 = vmax.f32 %v149_v31, 0.0 }
 0x103   :  { %v174_v34 = vpack.c.bf16 %v166_v33, %v165_v32 }
 0x105   :  { %286 = vmatmul.bf16.gmra.mxu1 %v174_v34  ;;  %v725_v34 = vld [vmem:[%s1040_s7] sm:$0xff] }
 0x106   :  { %532 = vmatpush.bf16.msra.mxu3 %v725_v34 }
 0x112   :  { %v252_v36 = vpop.f32.mrf.mxu1 }
 0x113   :  { %v253_v38 = vadd.f32 %v921_v37, %v252_v36 }
 0x115   :  { %v292_v41 = vmax.f32 %v253_v38, 0.0 }
 0x11a   :  { %v254_v39 = vpop.f32.mrf.mxu1 }
 0x11b   :  { %v255_v40 = vadd.f32 %v921_v37, %v254_v39  ;;  %v735_v39 = vld [vmem:[%s1039_s6] ss:$0 sm:$0xff] }
 0x11d   :  { %v293_v42 = vmax.f32 %v255_v40, 0.0 }
 0x11f   :  { %v308_v43 = vpack.c.bf16 %v293_v42, %v292_v41 }
 0x121   :  { %392 = vmatmul.bf16.vlgmr.msra.gmra.mxu2 %v308_v43 }
 0x122   :  { %v257_v35 = vpop.f32.mrf.mxu1 }
 0x123   :  { %v258_v44 = vadd.f32 %v921_v37, %v257_v35 }
 0x125   :  { %v294_v47 = vmax.f32 %v258_v44, 0.0 }
 0x12a   :  { %v259_v45 = vpop.f32.mrf.mxu1 }
 0x12b   :  { %v260_v46 = vadd.f32 %v921_v37, %v259_v45 }
 0x12d   :  { %v295_v48 = vmax.f32 %v260_v46, 0.0 }
 0x12f   :  { %v309_v49 = vpack.c.bf16 %v295_v48, %v294_v47 }
 0x131   :  { %397 = vmatmul.bf16.gmra.mxu2 %v309_v49 }
 0x132   :  { %v262_v50 = vpop.f32.mrf.mxu1 }
 0x133   :  { %v263_v51 = vadd.f32 %v921_v37, %v262_v50 }
 0x135   :  { %v296_v54 = vmax.f32 %v263_v51, 0.0 }
 0x13a   :  { %v264_v52 = vpop.f32.mrf.mxu1 }
 0x13b   :  { %v265_v53 = vadd.f32 %v921_v37, %v264_v52 }
 0x13d   :  { %v297_v55 = vmax.f32 %v265_v53, 0.0 }
 0x13f   :  { %v310_v56 = vpack.c.bf16 %v297_v55, %v296_v54 }
 0x141   :  { %402 = vmatmul.bf16.gmra.mxu2 %v310_v56 }
 0x142   :  { %v267_v57 = vpop.f32.mrf.mxu1 }
 0x143   :  { %v268_v58 = vadd.f32 %v921_v37, %v267_v57 }
 0x145   :  { %v298_v61 = vmax.f32 %v268_v58, 0.0 }
 0x14a   :  { %v269_v59 = vpop.f32.mrf.mxu1 }
 0x14b   :  { %v270_v60 = vadd.f32 %v921_v37, %v269_v59 }
 0x14d   :  { %v299_v62 = vmax.f32 %v270_v60, 0.0 }
 0x14f   :  { %v311_v63 = vpack.c.bf16 %v299_v62, %v298_v61 }
 0x151   :  { %407 = vmatmul.bf16.gmra.mxu2 %v311_v63 }
 0x152   :  { %v272_v0 = vpop.f32.mrf.mxu1 }
 0x153   :  { %v273_v1 = vadd.f32 %v921_v37, %v272_v0 }
 0x155   :  { %v300_v4 = vmax.f32 %v273_v1, 0.0 }
 0x15a   :  { %v274_v2 = vpop.f32.mrf.mxu1 }
 0x15b   :  { %v275_v3 = vadd.f32 %v921_v37, %v274_v2 }
 0x15d   :  { %v301_v5 = vmax.f32 %v275_v3, 0.0 }
 0x15f   :  { %v312_v6 = vpack.c.bf16 %v301_v5, %v300_v4 }
 0x161   :  { %412 = vmatmul.bf16.gmra.mxu2 %v312_v6 }
 0x162   :  { %v277_v7 = vpop.f32.mrf.mxu1 }
 0x163   :  { %v278_v8 = vadd.f32 %v921_v37, %v277_v7 }
 0x165   :  { %v302_v11 = vmax.f32 %v278_v8, 0.0 }
 0x16a   :  { %v279_v9 = vpop.f32.mrf.mxu1 }
 0x16b   :  { %v280_v10 = vadd.f32 %v921_v37, %v279_v9 }
 0x16d   :  { %v303_v12 = vmax.f32 %v280_v10, 0.0 }
 0x16f   :  { %v313_v13 = vpack.c.bf16 %v303_v12, %v302_v11 }
 0x171   :  { %417 = vmatmul.bf16.gmra.mxu2 %v313_v13 }
 0x172   :  { %v282_v15 = vpop.f32.mrf.mxu1 }
 0x173   :  { %v283_v18 = vadd.f32 %v921_v37, %v282_v15 }
 0x175   :  { %v304_v22 = vmax.f32 %v283_v18, 0.0 }
 0x17a   :  { %v284_v19 = vpop.f32.mrf.mxu1 }
 0x17b   :  { %v285_v20 = vadd.f32 %v921_v37, %v284_v19 }
 0x17d   :  { %v305_v23 = vmax.f32 %v285_v20, 0.0 }
 0x17f   :  { %v314_v24 = vpack.c.bf16 %v305_v23, %v304_v22 }
 0x181   :  { %422 = vmatmul.bf16.gmra.mxu2 %v314_v24 }
 0x182   :  { %v287_v25 = vpop.f32.mrf.mxu1 }
 0x183   :  { %v288_v28 = vadd.f32 %v921_v37, %v287_v25 }
 0x185   :  { %v306_v32 = vmax.f32 %v288_v28, 0.0 }
 0x18a   :  { %v289_v29 = vpop.f32.mrf.mxu1 }
 0x18b   :  { %v290_v31 = vadd.f32 %v921_v37, %v289_v29  ;;  %v736_v29 = vld [vmem:[%s1041_s8] ss:$0 sm:$0xff] }
 0x18d   :  { %v307_v33 = vmax.f32 %v290_v31, 0.0 }
 0x18f   :  { %v315_v36 = vpack.c.bf16 %v307_v33, %v306_v32 }
 0x191   :  { %427 = vmatmul.bf16.gmra.mxu2 %v315_v36 }
 0x1a4   :  { %v393_v38 = vpop.f32.mrf.mxu2 }
 0x1a5   :  { %v394_v40 = vadd.f32 %v735_v39, %v393_v38 }
 0x1a7   :  { %v433_v43 = vmax.f32 %v394_v40, 0.0 }
 0x1ac   :  { %v395_v41 = vpop.f32.mrf.mxu2 }
 0x1ad   :  { %v396_v42 = vadd.f32 %v735_v39, %v395_v41 }
 0x1af   :  { %v434_v37 = vmax.f32 %v396_v42, 0.0 }
 0x1b1   :  { %v449_v35 = vpack.c.bf16 %v434_v37, %v433_v43 }
 0x1b3   :  { %533 = vmatmul.bf16.vlgmr.msra.gmra.mxu3 %v449_v35 }
 0x1b4   :  { %v398_v44 = vpop.f32.mrf.mxu2 }
 0x1b5   :  { %v399_v45 = vadd.f32 %v735_v39, %v398_v44 }
 0x1b7   :  { %v435_v48 = vmax.f32 %v399_v45, 0.0 }
 0x1bc   :  { %v400_v46 = vpop.f32.mrf.mxu2 }
 0x1bd   :  { %v401_v47 = vadd.f32 %v735_v39, %v400_v46 }
 0x1bf   :  { %v436_v49 = vmax.f32 %v401_v47, 0.0 }
 0x1c1   :  { %v450_v50 = vpack.c.bf16 %v436_v49, %v435_v48 }
 0x1c3   :  { %538 = vmatmul.bf16.gmra.mxu3 %v450_v50 }
 0x1c4   :  { %v403_v51 = vpop.f32.mrf.mxu2 }
 0x1c5   :  { %v404_v52 = vadd.f32 %v735_v39, %v403_v51 }
 0x1c7   :  { %v437_v55 = vmax.f32 %v404_v52, 0.0 }
 0x1cc   :  { %v405_v53 = vpop.f32.mrf.mxu2 }
 0x1cd   :  { %v406_v54 = vadd.f32 %v735_v39, %v405_v53 }
 0x1cf   :  { %v438_v56 = vmax.f32 %v406_v54, 0.0 }
 0x1d1   :  { %v451_v57 = vpack.c.bf16 %v438_v56, %v437_v55 }
 0x1d3   :  { %543 = vmatmul.bf16.gmra.mxu3 %v451_v57 }
 0x1d4   :  { %v408_v58 = vpop.f32.mrf.mxu2 }
 0x1d5   :  { %v409_v59 = vadd.f32 %v735_v39, %v408_v58 }
 0x1d7   :  { %v439_v62 = vmax.f32 %v409_v59, 0.0 }
 0x1dc   :  { %v410_v60 = vpop.f32.mrf.mxu2 }
 0x1dd   :  { %v411_v61 = vadd.f32 %v735_v39, %v410_v60 }
 0x1df   :  { %v440_v63 = vmax.f32 %v411_v61, 0.0 }
 0x1e1   :  { %v452_v0 = vpack.c.bf16 %v440_v63, %v439_v62 }
 0x1e3   :  { %548 = vmatmul.bf16.gmra.mxu3 %v452_v0 }
 0x1e4   :  { %v413_v1 = vpop.f32.mrf.mxu2 }
 0x1e5   :  { %v414_v2 = vadd.f32 %v735_v39, %v413_v1 }
 0x1e7   :  { %v441_v5 = vmax.f32 %v414_v2, 0.0 }
 0x1ec   :  { %v415_v3 = vpop.f32.mrf.mxu2 }
 0x1ed   :  { %v416_v4 = vadd.f32 %v735_v39, %v415_v3 }
 0x1ef   :  { %v442_v6 = vmax.f32 %v416_v4, 0.0 }
 0x1f1   :  { %v453_v7 = vpack.c.bf16 %v442_v6, %v441_v5 }
 0x1f3   :  { %553 = vmatmul.bf16.gmra.mxu3 %v453_v7 }
 0x1f4   :  { %v418_v8 = vpop.f32.mrf.mxu2 }
 0x1f5   :  { %v419_v9 = vadd.f32 %v735_v39, %v418_v8 }
 0x1f7   :  { %v443_v12 = vmax.f32 %v419_v9, 0.0 }
 0x1fc   :  { %v420_v10 = vpop.f32.mrf.mxu2 }
 0x1fd   :  { %v421_v11 = vadd.f32 %v735_v39, %v420_v10 }
 0x1ff   :  { %v444_v13 = vmax.f32 %v421_v11, 0.0 }
 0x201   :  { %v454_v14 = vpack.c.bf16 %v444_v13, %v443_v12 }
 0x203   :  { %558 = vmatmul.bf16.gmra.mxu3 %v454_v14 }
 0x204   :  { %v423_v15 = vpop.f32.mrf.mxu2 }
 0x205   :  { %v424_v16 = vadd.f32 %v735_v39, %v423_v15 }
 0x207   :  { %v445_v19 = vmax.f32 %v424_v16, 0.0 }
 0x20c   :  { %v425_v17 = vpop.f32.mrf.mxu2 }
 0x20d   :  { %v426_v18 = vadd.f32 %v735_v39, %v425_v17 }
 0x20f   :  { %v446_v20 = vmax.f32 %v426_v18, 0.0 }
 0x211   :  { %v455_v21 = vpack.c.bf16 %v446_v20, %v445_v19 }
 0x213   :  { %563 = vmatmul.bf16.gmra.mxu3 %v455_v21 }
 0x214   :  { %v428_v22 = vpop.f32.mrf.mxu2 }
 0x215   :  { %v429_v23 = vadd.f32 %v735_v39, %v428_v22 }
 0x217   :  { %v447_v26 = vmax.f32 %v429_v23, 0.0 }
 0x21c   :  { %v430_v24 = vpop.f32.mrf.mxu2 }
 0x21d   :  { %v431_v25 = vadd.f32 %v735_v39, %v430_v24 }
 0x21f   :  { %v448_v27 = vmax.f32 %v431_v25, 0.0 }
 0x221   :  { %v456_v28 = vpack.c.bf16 %v448_v27, %v447_v26 }
 0x223   :  { %568 = vmatmul.bf16.gmra.mxu3 %v456_v28 }
 0x236   :  { %v534_v30 = vpop.f32.mrf.mxu3 }
 0x237   :  { %v535_v31 = vadd.f32 %v736_v29, %v534_v30 }
 0x239   :  { %575 = vst.msk [vmem:[%s1042_s9] sm:$0xff] %vm574_vm1, %v535_v31 }
 0x23e   :  { %v536_v32 = vpop.f32.mrf.mxu3 }
 0x23f   :  { %v537_v33 = vadd.f32 %v736_v29, %v536_v32 }
 0x241   :  { %576 = vst.msk [vmem:[%s1042_s9 + $0x8] sm:$0xff] %vm574_vm1, %v537_v33 }
 0x246   :  { %v539_v34 = vpop.f32.mrf.mxu3 }
 0x247   :  { %v540_v36 = vadd.f32 %v736_v29, %v539_v34 }
 0x249   :  { %577 = vst.msk [vmem:[%s1042_s9 + $0x10] sm:$0xff] %vm574_vm1, %v540_v36 }
 0x24e   :  { %v541_v38 = vpop.f32.mrf.mxu3 }
 0x24f   :  { %v542_v39 = vadd.f32 %v736_v29, %v541_v38 }
 0x251   :  { %578 = vst.msk [vmem:[%s1042_s9 + $0x18] sm:$0xff] %vm574_vm1, %v542_v39 }
 0x256   :  { %v544_v40 = vpop.f32.mrf.mxu3 }
 0x257   :  { %v545_v41 = vadd.f32 %v736_v29, %v544_v40 }
 0x259   :  { %579 = vst.msk [vmem:[%s1042_s9 + $0x20] sm:$0xff] %vm574_vm1, %v545_v41 }
 0x25e   :  { %v546_v42 = vpop.f32.mrf.mxu3 }
 0x25f   :  { %v547_v43 = vadd.f32 %v736_v29, %v546_v42 }
 0x261   :  { %580 = vst.msk [vmem:[%s1042_s9 + $0x28] sm:$0xff] %vm574_vm1, %v547_v43 }
 0x266   :  { %v549_v37 = vpop.f32.mrf.mxu3 }
 0x267   :  { %v550_v35 = vadd.f32 %v736_v29, %v549_v37 }
 0x269   :  { %581 = vst.msk [vmem:[%s1042_s9 + $0x30] sm:$0xff] %vm574_vm1, %v550_v35 }
 0x26e   :  { %v551_v44 = vpop.f32.mrf.mxu3 }
 0x26f   :  { %v552_v45 = vadd.f32 %v736_v29, %v551_v44 }
 0x271   :  { %582 = vst.msk [vmem:[%s1042_s9 + $0x38] sm:$0xff] %vm574_vm1, %v552_v45 }
 0x276   :  { %v554_v46 = vpop.f32.mrf.mxu3 }
 0x277   :  { %v555_v47 = vadd.f32 %v736_v29, %v554_v46 }
 0x279   :  { %583 = vst.msk [vmem:[%s1042_s9 + $0x40] sm:$0xff] %vm574_vm1, %v555_v47 }
 0x27e   :  { %v556_v48 = vpop.f32.mrf.mxu3 }
 0x27f   :  { %v557_v49 = vadd.f32 %v736_v29, %v556_v48 }
 0x281   :  { %584 = vst.msk [vmem:[%s1042_s9 + $0x48] sm:$0xff] %vm574_vm1, %v557_v49 }
 0x286   :  { %v559_v50 = vpop.f32.mrf.mxu3 }
 0x287   :  { %v560_v51 = vadd.f32 %v736_v29, %v559_v50 }
 0x289   :  { %585 = vst.msk [vmem:[%s1042_s9 + $0x50] sm:$0xff] %vm574_vm1, %v560_v51 }
 0x28e   :  { %v561_v52 = vpop.f32.mrf.mxu3 }
 0x28f   :  { %v562_v53 = vadd.f32 %v736_v29, %v561_v52 }
 0x291   :  { %586 = vst.msk [vmem:[%s1042_s9 + $0x58] sm:$0xff] %vm574_vm1, %v562_v53 }
 0x296   :  { %v564_v54 = vpop.f32.mrf.mxu3 }
 0x297   :  { %v565_v55 = vadd.f32 %v736_v29, %v564_v54 }
 0x299   :  { %587 = vst.msk [vmem:[%s1042_s9 + $0x60] sm:$0xff] %vm574_vm1, %v565_v55 }
 0x29e   :  { %v566_v56 = vpop.f32.mrf.mxu3 }
 0x29f   :  { %v567_v57 = vadd.f32 %v736_v29, %v566_v56 }
 0x2a1   :  { %588 = vst.msk [vmem:[%s1042_s9 + $0x68] sm:$0xff] %vm574_vm1, %v567_v57 }
 0x2a6   :  { %v569_v58 = vpop.f32.mrf.mxu3 }
 0x2a7   :  { %v570_v59 = vadd.f32 %v736_v29, %v569_v58 }
 0x2a9   :  { %589 = vst.msk [vmem:[%s1042_s9 + $0x70] sm:$0xff] %vm574_vm1, %v570_v59 }
 0x2ae   :  { %v571_v60 = vpop.f32.mrf.mxu3 }
 0x2af   :  { %v572_v61 = vadd.f32 %v736_v29, %v571_v60 }
 0x2b1   :  { %590 = vst.msk [vmem:[%s1042_s9 + $0x78] sm:$0xff] %vm574_vm1, %v572_v61 }

</bundles_post_ra>
